<compile_context>
chip_gen: v7x
topology: tpu7x:2x2x1
jax: 0.10.0
libtpu: 0.0.40
codegen_flags: <defaults>
</compile_context>

<pallas_src>
import functools

import jax
import jax.numpy as jnp
from jax import lax
from jax.experimental import pallas as pl
from jax.experimental.pallas import tpu as pltpu


def _round_up(x, m):
    return ((x + m - 1) // m) * m


def _focal_loss_kernel(logits_ref, targets_ref, out_ref, *, alpha, gamma):
    """One (TILE_N, C) tile of rows -> (1, TILE_N) lane-dense focal losses."""
    x = logits_ref[...].astype(jnp.float32)          # (TILE_N, C) f32 compute
    tgt = targets_ref[...]                           # (TILE_N, 1) int32
    tile_n, c = x.shape

    # Numerically stable log-sum-exp over classes (lane axis).
    m = jnp.max(x, axis=-1, keepdims=True)                               # (TILE_N, 1)
    lse = m + jnp.log(jnp.sum(jnp.exp(x - m), axis=-1, keepdims=True))   # (TILE_N, 1)

    # Target-class logit via masked select: one (1, C) iota row against the
    # (TILE_N, 1) targets — no full-tile one-hot temporaries.
    col_ids = lax.broadcasted_iota(jnp.int32, (1, c), 1)                 # (1, C)
    x_t = jnp.sum(jnp.where(col_ids == tgt, x, 0.0),
                  axis=-1, keepdims=True)                                # (TILE_N, 1)

    # Cross entropy; clamp tiny negative rounding so pt <= 1 and (1-pt) >= 0.
    ce = jnp.maximum(lse - x_t, 0.0)
    pt = jnp.exp(-ce)
    omp = 1.0 - pt

    g = float(gamma)
    if g == 2.0:                                      # default: pure VALU
        mod = omp * omp
    elif g == 1.0:
        mod = omp
    elif g == 0.0:
        mod = jnp.ones_like(omp)
    else:                                             # general (EUP pow path)
        mod = omp ** g

    focal_col = alpha * mod * ce                      # (TILE_N, 1)

    # Lane-dense store: broadcast the per-row column to a fully native
    # (TILE_N, 128) slab, one XLU transpose (XLU has slack), keep sublane 0.
    # Replaces TILE_N/8 lane-masked stores with TILE_N/128 stores.
    focal_row = jnp.transpose(jnp.broadcast_to(focal_col, (tile_n, 128)),
                              (1, 0))[0:1, :]         # (1, TILE_N)
    out_ref[...] = focal_row


def _tiling(c, in_itemsize, vmem_cap_bytes):
    """Pick (tile_n, vmem_limit_bytes) from a per-row VMEM byte estimate."""
    per_row = (2 * c * in_itemsize      # logits input block, double-buffered
               + 12 * c                 # f32 upcast + exp/where temps (~3 f32 tiles)
               + 2 * 512                # (TILE_N, 1) targets block, lane-padded, x2
               + 2 * 512                # (TILE_N,128) broadcast + (128,TILE_N) transpose
               + 64)                    # (1, TILE_N) f32 output rows, x2
    budget = int(0.30 * vmem_cap_bytes)             # ~19 MiB v7x, ~38 MiB v5e/v6e
    tile_n = budget // per_row
    tile_n = max(128, min(32 * 1024, (tile_n // 128) * 128))
    vmem_limit = int(min(0.85 * vmem_cap_bytes,
                         max(32 * 1024 * 1024, 2 * tile_n * per_row)))
    return tile_n, vmem_limit


def focal_loss(logits, targets, alpha=0.5, gamma=2.0, reduction="none"):
    """Pallas implementation of FocalLoss.forward.

    logits:  (N, C) float (f32 or bf16)
    targets: (N,)   int class indices
    alpha:   python scalar (baked into the kernel) or 1-D array (applied after)
    """
    orig_n, c = logits.shape
    n = orig_n
    targets2d = targets.astype(jnp.int32).reshape(n, 1)

    alpha_is_scalar = isinstance(alpha, (int, float))
    kernel_alpha = float(alpha) if alpha_is_scalar else 1.0

    try:
        vmem_cap = int(pltpu.get_tpu_info().vmem_capacity_bytes)
    except Exception:
        vmem_cap = 64 * 1024 * 1024                 # conservative (v7x-sized)
    tile_n, vmem_limit = _tiling(c, logits.dtype.itemsize, vmem_cap)

    # Tiny batches only: pad rows up to one 128-row tile.  (The full-copy tax
    # of jnp.pad only matters at large N, which never takes this branch.)
    if n < 128:
        pad = 128 - n
        logits = jnp.pad(logits, ((0, pad), (0, 0)))
        targets2d = jnp.pad(targets2d, ((0, pad), (0, 0)))
        n = 128

    # Block rows must not exceed the row extent; keep tile_n a multiple of 128.
    tile_n = min(tile_n, (n // 128) * 128)
    # Keep >= 2 grid steps when possible so ("parallel",) can use both v7x TCs.
    if n >= 256:
        tile_n = min(tile_n, _round_up(pl.cdiv(n, 2), 128))
    tile_n = max(128, tile_n)

    kernel = functools.partial(_focal_loss_kernel, alpha=kernel_alpha,
                               gamma=float(gamma))

    out = pl.pallas_call(
        kernel,
        out_shape=jax.ShapeDtypeStruct((1, n), jnp.float32),
        grid=(pl.cdiv(n, tile_n),),                    # ragged last block is fine
        in_specs=[
            pl.BlockSpec((tile_n, c), lambda i: (i, 0)),   # logits tile
            pl.BlockSpec((tile_n, 1), lambda i: (i, 0)),   # targets tile
        ],
        out_specs=pl.BlockSpec((1, tile_n), lambda i: (0, i)),  # lane-dense row
        compiler_params=pltpu.CompilerParams(
            dimension_semantics=("parallel",),         # shard N across TCs (v7x)
            vmem_limit_bytes=vmem_limit,
        ),
    )(logits, targets2d)

    focal = out[0, :orig_n]                            # (N,) — drops any padding

    if not alpha_is_scalar:
        focal = jnp.asarray(alpha, jnp.float32) * focal

    if reduction == "mean":
        return jnp.mean(focal)
    elif reduction == "sum":
        return jnp.sum(focal)
    return focal


def _reference_focal_loss(logits, targets, alpha=0.5, gamma=2.0):
    # Pure-JAX reference (matches F.cross_entropy(..., reduction='none')).
    logp = jax.nn.log_softmax(logits.astype(jnp.float32), axis=-1)
    ce = -jnp.take_along_axis(logp, targets[:, None].astype(jnp.int32),
                              axis=-1)[:, 0]
    pt = jnp.exp(-ce)
    return alpha * (1.0 - pt) ** gamma * ce


if __name__ == "__main__":
    key = jax.random.PRNGKey(0)
    k1, k2, k3, k4, k5, k6 = jax.random.split(key, 6)

    # Check 1: tiny f32 batch (small-N pad-to-128 path), reduction="none"/"mean".
    N1, C1 = 8, 32
    logits1 = jax.random.normal(k1, (N1, C1), dtype=jnp.float32)
    targets1 = jax.random.randint(k2, (N1,), 0, C1, dtype=jnp.int32)
    out1 = jax.block_until_ready(
        focal_loss(logits1, targets1, alpha=0.5, gamma=2.0, reduction="none"))
    ref1 = _reference_focal_loss(logits1, targets1, alpha=0.5, gamma=2.0)
    assert out1.shape == (N1,)
    assert jnp.allclose(out1, ref1, atol=1e-5, rtol=1e-5), (out1, ref1)
    out1m = jax.block_until_ready(
        focal_loss(logits1, targets1, alpha=0.5, gamma=2.0, reduction="mean"))
    assert jnp.allclose(out1m, jnp.mean(ref1), atol=1e-5, rtol=1e-5)

    # Check 2: bf16 logits in HBM (half the DMA bytes) + ragged tiny batch.
    N2, C2 = 12, 32
    logits2 = jax.random.normal(k3, (N2, C2), dtype=jnp.float32).astype(jnp.bfloat16)
    targets2 = jax.random.randint(k4, (N2,), 0, C2, dtype=jnp.int32)
    out2 = jax.block_until_ready(
        focal_loss(logits2, targets2, alpha=0.5, gamma=2.0, reduction="none"))
    ref2 = _reference_focal_loss(logits2.astype(jnp.float32), targets2,
                                 alpha=0.5, gamma=2.0)
    assert out2.shape == (N2,)
    assert jnp.allclose(out2, ref2, atol=1e-5, rtol=1e-5), (out2, ref2)

    # Check 3: multi-block batch with NO padding (2 grid steps, ragged last
    # block whose garbage tail rows must not contaminate valid rows).
    N3, C3 = 389, 32
    logits3 = jax.random.normal(k5, (N3, C3), dtype=jnp.float32)
    targets3 = jax.random.randint(k6, (N3,), 0, C3, dtype=jnp.int32)
    out3 = jax.block_until_ready(
        focal_loss(logits3, targets3, alpha=0.5, gamma=2.0, reduction="none"))
    ref3 = _reference_focal_loss(logits3, targets3, alpha=0.5, gamma=2.0)
    assert out3.shape == (N3,)
    assert jnp.allclose(out3, ref3, atol=1e-5, rtol=1e-5), (out3, ref3)

    print("KERNEL_OK")
</pallas_src>

<mosaic_0001>
module attributes {stable_mosaic.version = 11 : i64} {
  func.func @_focal_loss_kernel(%arg0: i32, %arg1: memref<128x32xf32, #tpu.memory_space<vmem>>, %arg2: memref<128x1xi32, #tpu.memory_space<vmem>>, %arg3: memref<1x128xf32, #tpu.memory_space<vmem>>) attributes {dimension_semantics = [#tpu.dimension_semantics<parallel>], iteration_bounds = array<i64: 1>, scalar_prefetch = 0 : i64, scratch_operands = 0 : i64, tpu.core_type = #tpu.core_type<tc>, window_params = [{transform_indices = @transform_0, window_bounds = array<i64: 128, 32>}, {transform_indices = @transform_1, window_bounds = array<i64: 128, 1>}, {transform_indices = @transform_2, window_bounds = array<i64: 1, 128>}]} {
    %c0 = arith.constant 0 : index
    %c0_0 = arith.constant 0 : index
    %0 = vector.load %arg1[%c0, %c0_0] : memref<128x32xf32, #tpu.memory_space<vmem>>, vector<128x32xf32>
    %c0_1 = arith.constant 0 : index
    %c0_2 = arith.constant 0 : index
    %1 = vector.load %arg2[%c0_1, %c0_2] : memref<128x1xi32, #tpu.memory_space<vmem>>, vector<128x1xi32>
    %cst = arith.constant dense<0xFF800000> : vector<128xf32>
    %2 = vector.multi_reduction <maximumf>, %0, %cst [1] : vector<128x32xf32> to vector<128xf32>
    %3 = vector.shape_cast %2 : vector<128xf32> to vector<128x1xf32>
    %4 = vector.broadcast %3 : vector<128x1xf32> to vector<128x32xf32>
    %5 = arith.subf %0, %4 : vector<128x32xf32>
    %6 = math.exp %5 : vector<128x32xf32>
    %cst_3 = arith.constant dense<0.000000e+00> : vector<128xf32>
    %7 = vector.multi_reduction <add>, %6, %cst_3 [1] : vector<128x32xf32> to vector<128xf32>
    %8 = vector.shape_cast %7 : vector<128xf32> to vector<128x1xf32>
    %9 = math.log %8 : vector<128x1xf32>
    %10 = arith.addf %3, %9 : vector<128x1xf32>
    %11 = tpu.iota {dimensions = array<i32: 1>} : vector<1x32xi32>
    %12 = vector.broadcast %11 : vector<1x32xi32> to vector<128x32xi32>
    %13 = vector.broadcast %1 : vector<128x1xi32> to vector<128x32xi32>
    %14 = arith.cmpi eq, %12, %13 : vector<128x32xi32>
    %cst_4 = arith.constant 0.000000e+00 : f32
    %15 = vector.broadcast %cst_4 : f32 to vector<128x32xf32>
    %16 = arith.select %14, %0, %15 : vector<128x32xi1>, vector<128x32xf32>
    %cst_5 = arith.constant dense<0.000000e+00> : vector<128xf32>
    %17 = vector.multi_reduction <add>, %16, %cst_5 [1] : vector<128x32xf32> to vector<128xf32>
    %18 = vector.shape_cast %17 : vector<128xf32> to vector<128x1xf32>
    %19 = arith.subf %10, %18 : vector<128x1xf32>
    %cst_6 = arith.constant 0.000000e+00 : f32
    %20 = vector.broadcast %cst_6 : f32 to vector<128x1xf32>
    %21 = arith.maximumf %19, %20 : vector<128x1xf32>
    %cst_7 = arith.constant 0.000000e+00 : f32
    %22 = vector.broadcast %cst_7 : f32 to vector<128x1xf32>
    %23 = arith.subf %22, %21 : vector<128x1xf32>
    %24 = math.exp %23 : vector<128x1xf32>
    %cst_8 = arith.constant 1.000000e+00 : f32
    %25 = vector.broadcast %cst_8 : f32 to vector<128x1xf32>
    %26 = arith.subf %25, %24 : vector<128x1xf32>
    %27 = arith.mulf %26, %26 : vector<128x1xf32>
    %cst_9 = arith.constant 5.000000e-01 : f32
    %28 = vector.broadcast %cst_9 : f32 to vector<128x1xf32>
    %29 = arith.mulf %28, %27 : vector<128x1xf32>
    %30 = arith.mulf %29, %21 : vector<128x1xf32>
    %31 = vector.shape_cast %30 : vector<128x1xf32> to vector<128x1xf32>
    %32 = vector.broadcast %31 : vector<128x1xf32> to vector<128x128xf32>
    %33 = tpu.transpose %32, [1, 0] : vector<128x128xf32> -> vector<128x128xf32>
    %34 = vector.extract_strided_slice %33 {offsets = [0, 0], sizes = [1, 128], strides = [1, 1]} : vector<128x128xf32> to vector<1x128xf32>
    %c0_10 = arith.constant 0 : index
    %c0_11 = arith.constant 0 : index
    %35 = vector.load %arg3[%c0_10, %c0_11] : memref<1x128xf32, #tpu.memory_space<vmem>>, vector<1x128xf32>
    tpu.vector_store %arg3[%c0_10, %c0_11], %34 {strides = array<i32>} : memref<1x128xf32, #tpu.memory_space<vmem>>, vector<1x128xf32>,
    return
  }
  func.func @transform_0(%arg0: i32) -> (i32, i32) {
    %c0_i32 = arith.constant 0 : i32
    %c0_i32_0 = arith.constant 0 : i32
    return %arg0, %c0_i32 : i32, i32
  }
  func.func @transform_1(%arg0: i32) -> (i32, i32) {
    %c0_i32 = arith.constant 0 : i32
    %c0_i32_0 = arith.constant 0 : i32
    return %arg0, %c0_i32 : i32, i32
  }
  func.func @transform_2(%arg0: i32) -> (i32, i32) {
    %c0_i32 = arith.constant 0 : i32
    %c0_i32_0 = arith.constant 0 : i32
    return %c0_i32, %arg0 : i32, i32
  }
}

</mosaic_0001>

<bundles_post_ra>
// kernel: tpu_custom_call.1
= control target key start
LH: loop header
LB: loop body
LE: loop exit
PB: predicated region body
PF: predicated region fallthrough
CT: control target
= control target key end

     0   :  { %vm44_vm0 = vcmask 261120   ;;  %v682_v6 = vmov 0   ;;  %s1076_s0 = inlined_call_operand.vmem [shape: f32[128,32], index: 0, kind: input, shape index: {}]   ;;  %s1077_s1 = inlined_call_operand.vmem [shape: s32[128,1], index: 1, kind: input, shape index: {}]   ;;  %s1078_s2 = inlined_call_operand.hbm [shape: f32[1,128], index: 2, kind: output, shape index: {}]  }
   0x1   :  { %v702_v0 = vld [vmem:[%s1076_s0 + $0x10] sm:$0xff]  ;;  %v707_v1 = vld [vmem:[%s1076_s0] sm:$0xff]  ;;  %v712_v2 = vld [vmem:[%s1076_s0 + $0x18] sm:$0xff]  ;;  %561 = vset.pattern.permute.xlu1 %v682_v6  ;;  %560 = vset.pattern.permute.xlu0 %v682_v6 }
   0x2   :  { %v51_v3 = vsel %vm44_vm0, %v702_v0, -inf  ;;  %v45_v4 = vsel %vm44_vm0, %v707_v1, -inf  ;;  %v721_v5 = vld [vmem:[%s1076_s0 + $0x8] sm:$0xff]  ;;  %v54_v7 = vsel %vm44_vm0, %v712_v2, -inf  ;;  %v735_v10 = vld [vmem:[%s1076_s0 + $0x20] sm:$0xff]  ;;  %v744_v13 = vld [vmem:[%s1076_s0 + $0x38] sm:$0xff] }
   0x3   :  { %52 = vmax.xlane.f32.xlu1 %v51_v3  ;;  %46 = vmax.xlane.f32.xlu0 %v45_v4  ;;  %v48_v8 = vsel %vm44_vm0, %v721_v5, -inf  ;;  %v730_v9 = vld [vmem:[%s1076_s0 + $0x28] sm:$0xff]  ;;  %v57_v12 = vsel %vm44_vm0, %v735_v10, -inf  ;;  %v749_v14 = vld [vmem:[%s1076_s0 + $0x30] sm:$0xff] }
   0x4   :  { %v60_v11 = vsel %vm44_vm0, %v730_v9, -inf }
   0x7   :  { %55 = vmax.xlane.f32.xlu1 %v54_v7  ;;  %49 = vmax.xlane.f32.xlu0 %v48_v8 }
   0xb   :  { %61 = vmax.xlane.f32.xlu1 %v60_v11  ;;  %58 = vmax.xlane.f32.xlu0 %v57_v12 }
   0xc   :  { %7 = vsyncpa [#allocation3], 0  ;;  %v66_v15 = vsel %vm44_vm0, %v744_v13, -inf  ;;  %v63_v16 = vsel %vm44_vm0, %v749_v14, -inf  ;;  %v758_v17 = vld [vmem:[%s1076_s0 + $0x48] sm:$0xff]  ;;  %v763_v18 = vld [vmem:[%s1076_s0 + $0x40] sm:$0xff] }
   0xd   :  { %v72_v19 = vsel %vm44_vm0, %v758_v17, -inf  ;;  %v69_v20 = vsel %vm44_vm0, %v763_v18, -inf  ;;  %v772_v21 = vld [vmem:[%s1076_s0 + $0x58] sm:$0xff]  ;;  %v777_v22 = vld [vmem:[%s1076_s0 + $0x50] sm:$0xff]  ;;  %v786_v25 = vld [vmem:[%s1076_s0 + $0x68] sm:$0xff] }
   0xe   :  { %v78_v23 = vsel %vm44_vm0, %v772_v21, -inf  ;;  %v75_v24 = vsel %vm44_vm0, %v777_v22, -inf  ;;  %v791_v26 = vld [vmem:[%s1076_s0 + $0x60] sm:$0xff]  ;;  %v84_v27 = vsel %vm44_vm0, %v786_v25, -inf  ;;  %v800_v29 = vld [vmem:[%s1076_s0 + $0x78] sm:$0xff]  ;;  %v805_v30 = vld [vmem:[%s1076_s0 + $0x70] sm:$0xff] }
   0xf   :  { %67 = vmax.xlane.f32.xlu1 %v66_v15  ;;  %64 = vmax.xlane.f32.xlu0 %v63_v16  ;;  %v81_v28 = vsel %vm44_vm0, %v791_v26, -inf  ;;  %v90_v31 = vsel %vm44_vm0, %v800_v29, -inf  ;;  %v87_v32 = vsel %vm44_vm0, %v805_v30, -inf  ;;  %v29_v33 = vld [vmem:[%s1077_s1 + $0x8] sm:$0xff]  ;;  %v30_v34 = vld [vmem:[%s1077_s1 + $0x10] sm:$0xff]  ;;  %v28_v35 = vld [vmem:[%s1077_s1] sm:$0xff] }
  0x10   :  { %v31_v36 = vld [vmem:[%s1077_s1 + $0x18] sm:$0xff]  ;;  %v37_v37 = vld [vmem:[%s1077_s1 + $0x48] sm:$0xff]  ;;  %v32_v38 = vld [vmem:[%s1077_s1 + $0x20] sm:$0xff] }
  0x11   :  { %v39_v39 = vld [vmem:[%s1077_s1 + $0x58] sm:$0xff]  ;;  %v33_v40 = vld [vmem:[%s1077_s1 + $0x28] sm:$0xff]  ;;  %v34_v42 = vld [vmem:[%s1077_s1 + $0x30] sm:$0xff] }
  0x12   :  { %v41_v41 = vld [vmem:[%s1077_s1 + $0x68] sm:$0xff]  ;;  %v43_v43 = vld [vmem:[%s1077_s1 + $0x78] sm:$0xff]  ;;  %v36_v45 = vld [vmem:[%s1077_s1 + $0x40] sm:$0xff] }
  0x13   :  { %73 = vmax.xlane.f32.xlu1 %v72_v19  ;;  %70 = vmax.xlane.f32.xlu0 %v69_v20  ;;  %v35_v44 = vld [vmem:[%s1077_s1 + $0x38] sm:$0xff]  ;;  %v38_v46 = vld [vmem:[%s1077_s1 + $0x50] sm:$0xff]  ;;  %v40_v47 = vld [vmem:[%s1077_s1 + $0x60] sm:$0xff] }
  0x14   :  { %v42_v48 = vld [vmem:[%s1077_s1 + $0x70] sm:$0xff]  ;;  %s683_s1 = smov [#allocation2]  }
  0x15   :  { %s550_s16 = sshll.u32 %s683_s1, 4  ;;  %s551_s16 = int_to_ptr.vmem [resolvable:$true] %s550_s16 }
  0x16   :  { %s658_s0 = scalar_lea.vmem %s551_s16, 16  ;;  %s662_s17 = scalar_lea.vmem %s551_s16, 32 }
  0x17   :  { %79 = vmax.xlane.f32.xlu1 %v78_v23  ;;  %76 = vmax.xlane.f32.xlu0 %v75_v24  ;;  %p659_p0 = scmp.ne.s32.totalorder %s551_s16, %s658_s0  ;;  %p663_p1 = scmp.lt.s32.totalorder %s551_s16, %s551_s16 }
  0x18   :  { %p664_p2 = scmp.lt.s32.totalorder %s662_s17, %s658_s0 }
  0x1a   :  { %p665_p3 = por %p664_p2, %p663_p1 }
  0x1b   :  { %85 = vmax.xlane.f32.xlu1 %v84_v27  ;;  %82 = vmax.xlane.f32.xlu0 %v81_v28 }
  0x1c   :  { %p666_p4 = pnand %p665_p3, %p659_p0 }
  0x1f   :  { %91 = vmax.xlane.f32.xlu1 %v90_v31  ;;  %88 = vmax.xlane.f32.xlu0 %v87_v32 }
  0x30   :  { %243 = vperm.xlu1 %561, %v29_v33  }
  0x34   :  { %246 = vperm.xlu1 %561, %v30_v34  }
  0x35   :  { %240 = vperm.xlu0 %560, %v28_v35  }
  0x38   :  { %249 = vperm.xlu1 %561, %v31_v36  }
  0x39   :  { %267 = vperm.xlu0 %560, %v37_v37  }
  0x3c   :  { %252 = vperm.xlu1 %561, %v32_v38  }
  0x3d   :  { %273 = vperm.xlu0 %560, %v39_v39  }
  0x40   :  { %255 = vperm.xlu1 %561, %v33_v40  }
  0x41   :  { %279 = vperm.xlu0 %560, %v41_v41   ;;  %v237_v41 = vlaneseq }
  0x44   :  { %258 = vperm.xlu1 %561, %v34_v42  }
  0x45   :  { %285 = vperm.xlu0 %560, %v43_v43  }
  0x48   :  { %261 = vperm.xlu1 %561, %v35_v44  }
  0x4c   :  { %264 = vperm.xlu1 %561, %v36_v45  }
  0x50   :  { %270 = vperm.xlu1 %561, %v38_v46  }
  0x54   :  { %276 = vperm.xlu1 %561, %v40_v47  }
  0x58   :  { %282 = vperm.xlu1 %561, %v42_v48   ;;  %v915_v48 = vand.u32 127, %v237_v41 }
  0x90   :  { %v859_v49 = vpop.xlane.xlu1 %52  ;;  %v861_v50 = vpop.xlane.xlu0 %46 }
  0x91   :  { %v93_v51 = vsub.f32 %v707_v1, %v861_v50 }
  0x93   :  { %v109_v52 = vmul.f32 1.442695, %v93_v51 }
  0x94   :  { %v865_v53 = vpop.xlane.xlu1 %55  ;;  %v867_v54 = vpop.xlane.xlu0 %49 }
  0x95   :  { %v96_v55 = vsub.f32 %v712_v2, %v865_v53  ;;  %562 = vpow2.f32 %v109_v52 }
  0x97   :  { %v115_v56 = vmul.f32 1.442695, %v96_v55 }
  0x98   :  { %v871_v57 = vpop.xlane.xlu1 %61  ;;  %v873_v58 = vpop.xlane.xlu0 %58 }
  0x99   :  { %564 = vpow2.f32 %v115_v56  ;;  %v98_v59 = vsub.f32 %v730_v9, %v871_v57 }
  0x9b   :  { %v119_v60 = vmul.f32 1.442695, %v98_v59 }
  0x9c   :  { %v877_v61 = vpop.xlane.xlu1 %67  ;;  %v879_v62 = vpop.xlane.xlu0 %64 }
  0x9d   :  { %566 = vpow2.f32 %v119_v60  ;;  %v100_v63 = vsub.f32 %v744_v13, %v877_v61 }
  0x9f   :  { %v123_v3 = vmul.f32 1.442695, %v100_v63  ;;  %v563_v4 = vpop.eup %562 }
  0xa0   :  { %v883_v6 = vpop.xlane.xlu1 %73  ;;  %v885_v7 = vpop.xlane.xlu0 %70  ;;  %v141_v12 = vsel %vm44_vm0, %v563_v4, 0.0 }
  0xa1   :  { %568 = vpow2.f32 %v123_v3  ;;  %v102_v8 = vsub.f32 %v758_v17, %v883_v6  ;;  %v101_v11 = vsub.f32 %v763_v18, %v885_v7  ;;  %142 = vadd.xlane.f32.xlu1 %v141_v12  ;;  %v94_v3 = vsub.f32 %v721_v5, %v867_v54 }
  0xa3   :  { %v565_v15 = vpop.eup %564  ;;  %v127_v16 = vmul.f32 1.442695, %v102_v8  ;;  %v125_v19 = vmul.f32 1.442695, %v101_v11 }
  0xa4   :  { %v892_v20 = vpop.xlane.xlu1 %79  ;;  %v894_v23 = vpop.xlane.xlu0 %76  ;;  %v150_v24 = vsel %vm44_vm0, %v565_v15, 0.0 }
  0xa5   :  { %570 = vpow2.f32 %v127_v16  ;;  %v103_v27 = vsub.f32 %v777_v22, %v894_v23  ;;  %v104_v28 = vsub.f32 %v772_v21, %v892_v20  ;;  %151 = vadd.xlane.f32.xlu1 %v150_v24 }
  0xa6   :  { %572 = vpow2.f32 %v125_v19 }
  0xa7   :  { %v567_v31 = vpop.eup %566  ;;  %v129_v32 = vmul.f32 1.442695, %v103_v27  ;;  %v131_v36 = vmul.f32 1.442695, %v104_v28 }
  0xa8   :  { %v901_v33 = vpop.xlane.xlu1 %85  ;;  %v156_v34 = vsel %vm44_vm0, %v567_v31, 0.0  ;;  %v904_v35 = vpop.xlane.xlu0 %82 }
  0xa9   :  { %157 = vadd.xlane.f32.xlu1 %v156_v34  ;;  %574 = vpow2.f32 %v129_v32  ;;  %v105_v38 = vsub.f32 %v791_v26, %v904_v35  ;;  %v106_v44 = vsub.f32 %v786_v25, %v901_v33 }
  0xaa   :  { %576 = vpow2.f32 %v131_v36 }
  0xab   :  { %v569_v37 = vpop.eup %568  ;;  %v133_v45 = vmul.f32 1.442695, %v105_v38  ;;  %v135_v55 = vmul.f32 1.442695, %v106_v44  ;;  %v99_v44 = vsub.f32 %v749_v14, %v879_v62 }
  0xac   :  { %v908_v39 = vpop.xlane.xlu1 %91  ;;  %v162_v40 = vsel %vm44_vm0, %v569_v37, 0.0  ;;  %v913_v46 = vpop.xlane.xlu0 %88  ;;  %v97_v37 = vsub.f32 %v735_v10, %v873_v58 }
  0xad   :  { %163 = vadd.xlane.f32.xlu1 %v162_v40  ;;  %578 = vpow2.f32 %v133_v45  ;;  %v107_v56 = vsub.f32 %v805_v30, %v913_v46  ;;  %v108_v15 = vsub.f32 %v800_v29, %v908_v39 }
  0xae   :  { %580 = vpow2.f32 %v135_v55  ;;  %v121_v55 = vmul.f32 1.442695, %v99_v44 }
  0xaf   :  { %v571_v42 = vpop.eup %570  ;;  %v137_v16 = vmul.f32 1.442695, %v107_v56  ;;  %v139_v31 = vmul.f32 1.442695, %v108_v15 }
  0xb0   :  { %v573_v43 = vpop.eup %572  ;;  %v244_v47 = vpop.permute.xlu1 %243  ;;  %v168_v52 = vsel %vm44_vm0, %v571_v42, 0.0 }
  0xb1   :  { %v165_v51 = vsel %vm44_vm0, %v573_v43, 0.0  ;;  %vm288_vm1 = vcmp.eq.s32.totalorder %v915_v48, %v244_v47  ;;  %582 = vpow2.f32 %v137_v16  ;;  %v117_v43 = vmul.f32 1.442695, %v97_v37 }
  0xb2   :  { %166 = vadd.xlane.f32.xlu1 %v165_v51  ;;  %v304_v8 = vsel %vm288_vm1, %v721_v5, 0.0  ;;  %v111_v5 = vmul.f32 1.442695, %v94_v3 }
  0xb3   :  { %v575_v63 = vpop.eup %574  ;;  %v322_v27 = vsel %vm44_vm0, %v304_v8, 0.0 }
  0xb4   :  { %v247_v59 = vpop.permute.xlu1 %246  ;;  %v241_v60 = vpop.permute.xlu0 %240  ;;  %v171_v24 = vsel %vm44_vm0, %v575_v63, 0.0  ;;  %584 = vpow2.f32 %v111_v5 }
  0xb5   :  { %vm287_vm2 = vcmp.eq.s32.totalorder %v915_v48, %v241_v60  ;;  %v577_v12 = vpop.eup %576  ;;  %vm289_vm3 = vcmp.eq.s32.totalorder %v915_v48, %v247_v59  ;;  %586 = vpow2.f32 %v139_v31 }
  0xb6   :  { %169 = vadd.xlane.f32.xlu1 %v168_v52  ;;  %v303_v4 = vsel %vm287_vm2, %v707_v1, 0.0  ;;  %v95_v1 = vsub.f32 %v702_v0, %v859_v49  ;;  %v174_v28 = vsel %vm44_vm0, %v577_v12, 0.0  ;;  %v305_v32 = vsel %vm289_vm3, %v702_v0, 0.0 }
  0xb7   :  { %v319_v11 = vsel %vm44_vm0, %v303_v4, 0.0  ;;  %v579_v34 = vpop.eup %578  ;;  %v325_v40 = vsel %vm44_vm0, %v305_v32, 0.0 }
  0xb8   :  { %v250_v19 = vpop.permute.xlu1 %249  ;;  %320 = vadd.xlane.f32.xlu0 %v319_v11  ;;  %v113_v36 = vmul.f32 1.442695, %v95_v1  ;;  %v177_v0 = vsel %vm44_vm0, %v579_v34, 0.0  ;;  %v581_v42 = vpop.eup %580 }
  0xb9   :  { %vm290_vm4 = vcmp.eq.s32.totalorder %v915_v48, %v250_v19  ;;  %v268_v45 = vpop.permute.xlu0 %267  ;;  %v180_v52 = vsel %vm44_vm0, %v581_v42, 0.0 }
  0xba   :  { %172 = vadd.xlane.f32.xlu1 %v171_v24  ;;  %v306_v41 = vsel %vm290_vm4, %v712_v2, 0.0  ;;  %588 = vpow2.f32 %v113_v36  ;;  %vm296_vm6 = vcmp.eq.s32.totalorder %v915_v48, %v268_v45 }
  0xbb   :  { %v328_v47 = vsel %vm44_vm0, %v306_v41, 0.0  ;;  %v583_v2 = vpop.eup %582  ;;  %590 = vpow2.f32 %v117_v43  ;;  %v312_v16 = vsel %vm296_vm6, %v758_v17, 0.0 }
  0xbc   :  { %323 = vadd.xlane.f32.xlu0 %v322_v27  ;;  %v253_v38 = vpop.permute.xlu1 %252  ;;  %v183_v3 = vsel %vm44_vm0, %v583_v2, 0.0  ;;  %592 = vpow2.f32 %v121_v55  ;;  %v346_v27 = vsel %vm44_vm0, %v312_v16, 0.0 }
  0xbd   :  { %vm291_vm5 = vcmp.eq.s32.totalorder %v915_v48, %v253_v38  ;;  %v274_v63 = vpop.permute.xlu0 %273 }
  0xbe   :  { %175 = vadd.xlane.f32.xlu1 %v174_v28  ;;  %v307_v51 = vsel %vm291_vm5, %v735_v10, 0.0  ;;  %v585_v60 = vpop.eup %584  ;;  %vm298_vm7 = vcmp.eq.s32.totalorder %v915_v48, %v274_v63 }
  0xbf   :  { %v331_v59 = vsel %vm44_vm0, %v307_v51, 0.0  ;;  %v587_v4 = vpop.eup %586  ;;  %v144_v10 = vsel %vm44_vm0, %v585_v60, 0.0  ;;  %v314_v5 = vsel %vm298_vm7, %v772_v21, 0.0 }
  0xc0   :  { %326 = vadd.xlane.f32.xlu0 %v325_v40  ;;  %v256_v56 = vpop.permute.xlu1 %255  ;;  %v186_v12 = vsel %vm44_vm0, %v587_v4, 0.0  ;;  %v352_v17 = vsel %vm44_vm0, %v314_v5, 0.0 }
  0xc1   :  { %v280_v15 = vpop.permute.xlu0 %279  ;;  %vm292_vm9 = vcmp.eq.s32.totalorder %v915_v48, %v256_v56 }
  0xc2   :  { %178 = vadd.xlane.f32.xlu1 %v177_v0  ;;  %vm300_vm8 = vcmp.eq.s32.totalorder %v915_v48, %v280_v15  ;;  %v308_v21 = vsel %vm292_vm9, %v730_v9, 0.0 }
  0xc3   :  { %v316_v34 = vsel %vm300_vm8, %v786_v25, 0.0  ;;  %v334_v41 = vsel %vm44_vm0, %v308_v21, 0.0 }
  0xc4   :  { %329 = vadd.xlane.f32.xlu0 %v328_v47  ;;  %v589_v8 = vpop.eup %588  ;;  %v259_v11 = vpop.permute.xlu1 %258  ;;  %v358_v38 = vsel %vm44_vm0, %v316_v34, 0.0 }
  0xc5   :  { %v147_v19 = vsel %vm44_vm0, %v589_v8, 0.0  ;;  %v591_v24 = vpop.eup %590  ;;  %v286_v32 = vpop.permute.xlu0 %285  ;;  %vm293_vm11 = vcmp.eq.s32.totalorder %v915_v48, %v259_v11 }
  0xc6   :  { %181 = vadd.xlane.f32.xlu1 %v180_v52  ;;  %v153_v28 = vsel %vm44_vm0, %v591_v24, 0.0  ;;  %v593_v31 = vpop.eup %592  ;;  %vm302_vm10 = vcmp.eq.s32.totalorder %v915_v48, %v286_v32  ;;  %v309_v25 = vsel %vm293_vm11, %v749_v14, 0.0 }
  0xc7   :  { %v159_v36 = vsel %vm44_vm0, %v593_v31, 0.0  ;;  %v318_v40 = vsel %vm302_vm10, %v800_v29, 0.0  ;;  %v337_v9 = vsel %vm44_vm0, %v309_v25, 0.0 }
  0xc8   :  { %332 = vadd.xlane.f32.xlu0 %v331_v59  ;;  %v262_v1 = vpop.permute.xlu1 %261  ;;  %v364_v0 = vsel %vm44_vm0, %v318_v40, 0.0 }
  0xc9   :  { %vm294_vm12 = vcmp.eq.s32.totalorder %v915_v48, %v262_v1 }
  0xca   :  { %184 = vadd.xlane.f32.xlu1 %v183_v3  ;;  %v310_v43 = vsel %vm294_vm12, %v744_v13, 0.0 }
  0xcb   :  { %v340_v29 = vsel %vm44_vm0, %v310_v43, 0.0 }
  0xcc   :  { %145 = vadd.xlane.f32.xlu0 %v144_v10  ;;  %v265_v37 = vpop.permute.xlu1 %264 }
  0xcd   :  { %vm295_vm13 = vcmp.eq.s32.totalorder %v915_v48, %v265_v37 }
  0xce   :  { %187 = vadd.xlane.f32.xlu1 %v186_v12  ;;  %v311_v45 = vsel %vm295_vm13, %v763_v18, 0.0 }
  0xcf   :  { %v343_v14 = vsel %vm44_vm0, %v311_v45, 0.0 }
  0xd0   :  { %148 = vadd.xlane.f32.xlu0 %v147_v19  ;;  %v271_v42 = vpop.permute.xlu1 %270 }
  0xd1   :  { %vm297_vm14 = vcmp.eq.s32.totalorder %v915_v48, %v271_v42 }
  0xd2   :  { %347 = vadd.xlane.f32.xlu1 %v346_v27  ;;  %v313_v47 = vsel %vm297_vm14, %v777_v22, 0.0 }
  0xd3   :  { %v349_v13 = vsel %vm44_vm0, %v313_v47, 0.0 }
  0xd4   :  { %154 = vadd.xlane.f32.xlu0 %v153_v28  ;;  %v277_v44 = vpop.permute.xlu1 %276 }
  0xd5   :  { %vm299_vm15 = vcmp.eq.s32.totalorder %v915_v48, %v277_v44 }
  0xd6   :  { %353 = vadd.xlane.f32.xlu1 %v352_v17  ;;  %v315_v52 = vsel %vm299_vm15, %v791_v26, 0.0 }
  0xd7   :  { %v355_v2 = vsel %vm44_vm0, %v315_v52, 0.0 }
  0xd8   :  { %160 = vadd.xlane.f32.xlu0 %v159_v36  ;;  %v283_v51 = vpop.permute.xlu1 %282 }
  0xd9   :  { %vm301_vm1 = vcmp.eq.s32.totalorder %v915_v48, %v283_v51 }
  0xda   :  { %359 = vadd.xlane.f32.xlu1 %v358_v38  ;;  %v317_v18 = vsel %vm301_vm1, %v805_v30, 0.0 }
  0xdb   :  { %v361_v55 = vsel %vm44_vm0, %v317_v18, 0.0 }
  0xdc   :  { %335 = vadd.xlane.f32.xlu0 %v334_v41 }
  0xde   :  { %365 = vadd.xlane.f32.xlu1 %v364_v0 }
  0xe0   :  { %338 = vadd.xlane.f32.xlu0 %v337_v9 }
  0xe4   :  { %341 = vadd.xlane.f32.xlu0 %v340_v29 }
  0xe8   :  { %344 = vadd.xlane.f32.xlu0 %v343_v14 }
  0xec   :  { %350 = vadd.xlane.f32.xlu0 %v349_v13 }
  0xf0   :  { %356 = vadd.xlane.f32.xlu0 %v355_v2 }
  0xf4   :  { %362 = vadd.xlane.f32.xlu0 %v361_v55 }
 0x12e   :  { %v143_v56 = vpop.xlane.xlu1 %142 }
 0x12f   :  { %594 = vlog2.f32 %v143_v56 }
 0x132   :  { %v152_v22 = vpop.xlane.xlu1 %151 }
 0x133   :  { %596 = vlog2.f32 %v152_v22 }
 0x136   :  { %v158_v59 = vpop.xlane.xlu1 %157 }
 0x139   :  { %v595_v60 = vpop.eup %594 }
 0x13a   :  { %v190_v63 = vmul.f32 0.6931472, %v595_v60  ;;  %v164_v3 = vpop.xlane.xlu1 %163 }
 0x13c   :  { %v221_v4 = vadd.f32 %v190_v63, %v861_v50 }
 0x13d   :  { %v597_v1 = vpop.eup %596 }
 0x13e   :  { %v196_v32 = vmul.f32 0.6931472, %v597_v1 }
 0x13f   :  { %v167_v10 = vpop.xlane.xlu1 %166 }
 0x140   :  { %v224_v38 = vadd.f32 %v196_v32, %v865_v53 }
 0x143   :  { %v170_v15 = vpop.xlane.xlu1 %169 }
 0x145   :  { %v321_v26 = vpop.xlane.xlu0 %320 }
 0x146   :  { %v367_v48 = vsub.f32 %v221_v4, %v321_v26 }
 0x147   :  { %v173_v24 = vpop.xlane.xlu1 %172 }
 0x148   :  { %v383_v8 = vmax.f32 %v367_v48, 0.0 }
 0x149   :  { %v324_v11 = vpop.xlane.xlu0 %323 }
 0x14a   :  { %v399_v12 = vsub.f32 0.0, %v383_v8 }
 0x14b   :  { %v176_v28 = vpop.xlane.xlu1 %175 }
 0x14c   :  { %v415_v30 = vmul.f32 1.442695, %v399_v12 }
 0x14d   :  { %v327_v16 = vpop.xlane.xlu0 %326 }
 0x14e   :  { %598 = vpow2.f32 %v415_v30 }
 0x14f   :  { %600 = vlog2.f32 %v158_v59  ;;  %v179_v37 = vpop.xlane.xlu1 %178 }
 0x151   :  { %v330_v19 = vpop.xlane.xlu0 %329 }
 0x152   :  { %v370_v41 = vsub.f32 %v224_v38, %v330_v19 }
 0x153   :  { %v182_v42 = vpop.xlane.xlu1 %181 }
 0x154   :  { %v993_v43 = vmax.f32 %v370_v41, 0.0 }
 0x155   :  { %v990_v27 = vpop.xlane.xlu0 %332 }
 0x156   :  { %v402_v51 = vsub.f32 0.0, %v993_v43 }
 0x157   :  { %v185_v2 = vpop.xlane.xlu1 %184 }
 0x158   :  { %v599_v5 = vpop.eup %598 }
 0x159   :  { %v447_v50 = vsub.f32 1.0, %v599_v5  ;;  %v146_v31 = vpop.xlane.xlu0 %145  ;;  %v601_v40 = vpop.eup %600 }
 0x15a   :  { %602 = vlog2.f32 %v146_v31  ;;  %v200_v0 = vmul.f32 0.6931472, %v601_v40 }
 0x15b   :  { %v463_v17 = vmul.f32 %v447_v50, %v447_v50  ;;  %v188_v30 = vpop.xlane.xlu1 %187 }
 0x15c   :  { %v226_v53 = vadd.f32 %v200_v0, %v871_v57 }
 0x15d   :  { %v479_v34 = vmul.f32 0.5, %v463_v17  ;;  %v149_v36 = vpop.xlane.xlu0 %148 }
 0x15e   :  { %604 = vlog2.f32 %v149_v36 }
 0x15f   :  { %606 = vlog2.f32 %v164_v3  ;;  %v495_v21 = vmul.f32 %v479_v34, %v383_v8  ;;  %v421_v3 = vmul.f32 1.442695, %v402_v51 }
 0x161   :  { %511 = vxpose.xlu0.b32.start [1/16] (narrow) %v495_v21, 8  ;;  %v155_v25 = vpop.xlane.xlu0 %154  ;;  %v348_v21 = vpop.xlane.xlu1 %347 }
 0x162   :  { %608 = vlog2.f32 %v155_v25 }
 0x163   :  { %610 = vlog2.f32 %v167_v10 }
 0x164   :  { %v603_v9 = vpop.eup %602  ;;  %612 = vlog2.f32 %v170_v15 }
 0x165   :  { %v161_v29 = vpop.xlane.xlu0 %160  ;;  %v192_v44 = vmul.f32 0.6931472, %v603_v9 }
 0x166   :  { %614 = vlog2.f32 %v161_v29 }
 0x167   :  { %v222_v14 = vadd.f32 %v192_v44, %v867_v54  ;;  %616 = vlog2.f32 %v173_v24 }
 0x168   :  { %v605_v45 = vpop.eup %604  ;;  %618 = vlog2.f32 %v176_v28 }
 0x169   :  { %v607_v47 = vpop.eup %606  ;;  %v194_v13 = vmul.f32 0.6931472, %v605_v45  ;;  %v336_v52 = vpop.xlane.xlu0 %335  ;;  %v368_v18 = vsub.f32 %v222_v14, %v324_v11  ;;  %620 = vpow2.f32 %v421_v3 }
 0x16a   :  { %v372_v55 = vsub.f32 %v226_v53, %v336_v52  ;;  %v204_v59 = vmul.f32 0.6931472, %v607_v47 }
 0x16b   :  { %v223_v56 = vadd.f32 %v194_v13, %v859_v49  ;;  %v999_v60 = vmax.f32 %v368_v18, 0.0 }
 0x16c   :  { %v609_v22 = vpop.eup %608  ;;  %v1002_v10 = vmax.f32 %v372_v55, 0.0  ;;  %v228_v19 = vadd.f32 %v204_v59, %v877_v61 }
 0x16d   :  { %v611_v63 = vpop.eup %610  ;;  %v369_v54 = vsub.f32 %v223_v56, %v327_v16  ;;  %v198_v4 = vmul.f32 0.6931472, %v609_v22  ;;  %v339_v57 = vpop.xlane.xlu0 %338  ;;  %v400_v26 = vsub.f32 0.0, %v999_v60 }
 0x16e   :  { %v613_v48 = vpop.eup %612  ;;  %v206_v12 = vmul.f32 0.6931472, %v611_v63  ;;  %v404_v28 = vsub.f32 0.0, %v1002_v10  ;;  %v354_v56 = vpop.xlane.xlu1 %353 }
 0x16f   :  { %v1004_v8 = vmax.f32 %v369_v54, 0.0  ;;  %v225_v11 = vadd.f32 %v198_v4, %v873_v58  ;;  %v417_v15 = vmul.f32 1.442695, %v400_v26  ;;  %v208_v31 = vmul.f32 0.6931472, %v613_v48 }
 0x170   :  { %v615_v49 = vpop.eup %614  ;;  %v229_v61 = vadd.f32 %v206_v12, %v885_v7  ;;  %v425_v38 = vmul.f32 1.442695, %v404_v28 }
 0x171   :  { %v401_v16 = vsub.f32 0.0, %v1004_v8  ;;  %v371_v24 = vsub.f32 %v225_v11, %v990_v27  ;;  %v202_v1 = vmul.f32 0.6931472, %v615_v49  ;;  %v342_v5 = vpop.xlane.xlu0 %341  ;;  %622 = vpow2.f32 %v417_v15  ;;  %v617_v34 = vpop.eup %616 }
 0x172   :  { %v374_v50 = vsub.f32 %v228_v19, %v342_v5  ;;  %624 = vlog2.f32 %v179_v37  ;;  %v230_v37 = vadd.f32 %v208_v31, %v883_v6  ;;  %v619_v9 = vpop.eup %618  ;;  %v210_v29 = vmul.f32 0.6931472, %v617_v34 }
 0x173   :  { %v419_v58 = vmul.f32 1.442695, %v401_v16  ;;  %v1011_v32 = vmax.f32 %v371_v24, 0.0  ;;  %v227_v17 = vadd.f32 %v202_v1, %v879_v62  ;;  %v621_v53 = vpop.eup %620  ;;  %v212_v47 = vmul.f32 0.6931472, %v619_v9 }
 0x174   :  { %v1016_v41 = vmax.f32 %v374_v50, 0.0  ;;  %v376_v7 = vsub.f32 %v230_v37, %v348_v21  ;;  %v231_v13 = vadd.f32 %v210_v29, %v894_v23  ;;  %v450_v54 = vsub.f32 1.0, %v621_v53 }
 0x175   :  { %626 = vpow2.f32 %v419_v58  ;;  %v403_v36 = vsub.f32 0.0, %v1011_v32  ;;  %v345_v27 = vpop.xlane.xlu0 %344  ;;  %v373_v40 = vsub.f32 %v227_v17, %v339_v57 }
 0x176   :  { %v375_v25 = vsub.f32 %v229_v61, %v345_v27  ;;  %628 = vlog2.f32 %v182_v42  ;;  %v406_v45 = vsub.f32 0.0, %v1016_v41  ;;  %v1026_v18 = vmax.f32 %v376_v7, 0.0 }
 0x177   :  { %v423_v0 = vmul.f32 1.442695, %v403_v36  ;;  %v1019_v62 = vmax.f32 %v373_v40, 0.0  ;;  %v466_v19 = vmul.f32 %v450_v54, %v450_v54 }
 0x178   :  { %v1023_v14 = vmax.f32 %v375_v25, 0.0  ;;  %v429_v22 = vmul.f32 1.442695, %v406_v45  ;;  %v408_v49 = vsub.f32 0.0, %v1026_v18 }
 0x179   :  { %630 = vpow2.f32 %v423_v0  ;;  %v405_v44 = vsub.f32 0.0, %v1019_v62  ;;  %v351_v42 = vpop.xlane.xlu0 %350  ;;  %v482_v21 = vmul.f32 0.5, %v466_v19 }
 0x17a   :  { %632 = vpow2.f32 %v425_v38  ;;  %v407_v59 = vsub.f32 0.0, %v1023_v14  ;;  %v377_v63 = vsub.f32 %v231_v13, %v351_v42  ;;  %v433_v34 = vmul.f32 1.442695, %v408_v49  ;;  %v360_v38 = vpop.xlane.xlu1 %359 }
 0x17b   :  { %634 = vlog2.f32 %v185_v2  ;;  %v623_v51 = vpop.eup %622  ;;  %v427_v6 = vmul.f32 1.442695, %v405_v44  ;;  %v232_v2 = vadd.f32 %v212_v47, %v892_v20  ;;  %v498_v53 = vmul.f32 %v482_v21, %v993_v43 }
 0x17c   :  { %636 = vlog2.f32 %v188_v30  ;;  %v625_v52 = vpop.eup %624  ;;  %v448_v55 = vsub.f32 1.0, %v623_v51  ;;  %v431_v12 = vmul.f32 1.442695, %v407_v59  ;;  %v1031_v15 = vmax.f32 %v377_v63, 0.0 }
 0x17d   :  { %638 = vpow2.f32 %v427_v6  ;;  %v214_v57 = vmul.f32 0.6931472, %v625_v52  ;;  %v378_v11 = vsub.f32 %v232_v2, %v354_v56  ;;  %v357_v16 = vpop.xlane.xlu0 %356 }
 0x17e   :  { %v464_v4 = vmul.f32 %v448_v55, %v448_v55  ;;  %640 = vpow2.f32 %v429_v22  ;;  %v409_v36 = vsub.f32 0.0, %v1031_v15  ;;  %v366_v63 = vpop.xlane.xlu1 %365 }
 0x17f   :  { %v627_v3 = vpop.eup %626  ;;  %v233_v28 = vadd.f32 %v214_v57, %v904_v35  ;;  %v1035_v58 = vmax.f32 %v378_v11, 0.0  ;;  %642 = vpow2.f32 %v431_v12 }
 0x180   :  { %v449_v26 = vsub.f32 1.0, %v627_v3  ;;  %v629_v48 = vpop.eup %628  ;;  %v480_v23 = vmul.f32 0.5, %v464_v4  ;;  %644 = vpow2.f32 %v433_v34  ;;  %v435_v44 = vmul.f32 1.442695, %v409_v36 }
 0x181   :  { %v216_v20 = vmul.f32 0.6931472, %v629_v48  ;;  %v379_v27 = vsub.f32 %v233_v28, %v357_v16  ;;  %v410_v29 = vsub.f32 0.0, %v1035_v58  ;;  %v363_v51 = vpop.xlane.xlu0 %362 }
 0x182   :  { %v496_v24 = vmul.f32 %v480_v23, %v999_v60  ;;  %v465_v1 = vmul.f32 %v449_v26, %v449_v26  ;;  %646 = vpow2.f32 %v435_v44 }
 0x183   :  { %v631_v30 = vpop.eup %630  ;;  %v234_v0 = vadd.f32 %v216_v20, %v901_v33  ;;  %v1041_v45 = vmax.f32 %v379_v27, 0.0  ;;  %v437_v52 = vmul.f32 1.442695, %v410_v29 }
 0x184   :  { %v633_v5 = vpop.eup %632  ;;  %v451_v50 = vsub.f32 1.0, %v631_v30  ;;  %512 = vxpose.xlu0.b32.cont [2/16] (narrow) %v496_v24, 8  ;;  %v481_v17 = vmul.f32 0.5, %v465_v1 }
 0x185   :  { %v635_v31 = vpop.eup %634  ;;  %v452_v60 = vsub.f32 1.0, %v633_v5  ;;  %v380_v7 = vsub.f32 %v234_v0, %v360_v38  ;;  %v411_v56 = vsub.f32 0.0, %v1041_v45  ;;  %648 = vpow2.f32 %v437_v52 }
 0x186   :  { %v637_v61 = vpop.eup %636  ;;  %v497_v40 = vmul.f32 %v481_v17, %v1004_v8  ;;  %v467_v25 = vmul.f32 %v451_v50, %v451_v50  ;;  %v218_v35 = vmul.f32 0.6931472, %v635_v31 }
 0x187   :  { %v639_v37 = vpop.eup %638  ;;  %v220_v9 = vmul.f32 0.6931472, %v637_v61  ;;  %v468_v47 = vmul.f32 %v452_v60, %v452_v60  ;;  %v1046_v55 = vmax.f32 %v380_v7, 0.0 }
 0x188   :  { %513 = vxpose.xlu0.b32.cont [3/16] (narrow) %v497_v40, 8  ;;  %v453_v42 = vsub.f32 1.0, %v639_v37  ;;  %v483_v8 = vmul.f32 0.5, %v467_v25  ;;  %v641_v6 = vpop.eup %640  ;;  %v235_v13 = vadd.f32 %v218_v35, %v913_v46 }
 0x189   :  { %v236_v33 = vadd.f32 %v220_v9, %v908_v39  ;;  %v484_v59 = vmul.f32 0.5, %v468_v47  ;;  %v454_v3 = vsub.f32 1.0, %v641_v6  ;;  %v643_v2 = vpop.eup %642  ;;  %v412_v46 = vsub.f32 0.0, %v1046_v55 }
 0x18a   :  { %v381_v22 = vsub.f32 %v235_v13, %v363_v51  ;;  %v469_v43 = vmul.f32 %v453_v42, %v453_v42  ;;  %v499_v54 = vmul.f32 %v483_v8, %v1011_v32  ;;  %v439_v39 = vmul.f32 1.442695, %v411_v56  ;;  %v645_v49 = vpop.eup %644 }
 0x18b   :  { %v382_v4 = vsub.f32 %v236_v33, %v366_v63  ;;  %v500_v26 = vmul.f32 %v484_v59, %v1002_v10  ;;  %v470_v11 = vmul.f32 %v454_v3, %v454_v3  ;;  %v455_v23 = vsub.f32 1.0, %v643_v2 }
 0x18c   :  { %514 = vxpose.xlu0.b32.cont [4/16] (narrow) %v498_v53, 8  ;;  %v1051_v57 = vmax.f32 %v381_v22, 0.0  ;;  %v485_v48 = vmul.f32 0.5, %v469_v43  ;;  %v441_v12 = vmul.f32 1.442695, %v412_v46  ;;  %650 = vpow2.f32 %v439_v39  ;;  %v647_v5 = vpop.eup %646 }
 0x18d   :  { %v398_v30 = vmax.f32 %v382_v4, 0.0  ;;  %v456_v19 = vsub.f32 1.0, %v645_v49  ;;  %v486_v24 = vmul.f32 0.5, %v470_v11  ;;  %v471_v1 = vmul.f32 %v455_v23, %v455_v23 }
 0x18e   :  { %v413_v32 = vsub.f32 0.0, %v1051_v57  ;;  %v501_v16 = vmul.f32 %v485_v48, %v1019_v62  ;;  %652 = vpow2.f32 %v441_v12  ;;  %v457_v61 = vsub.f32 1.0, %v647_v5 }
 0x18f   :  { %v414_v20 = vsub.f32 0.0, %v398_v30  ;;  %v649_v28 = vpop.eup %648  ;;  %v472_v50 = vmul.f32 %v456_v19, %v456_v19  ;;  %v502_v31 = vmul.f32 %v486_v24, %v1016_v41  ;;  %v487_v17 = vmul.f32 0.5, %v471_v1 }
 0x190   :  { %515 = vxpose.xlu0.b32.cont [5/16] (narrow) %v499_v54, 8  ;;  %v443_v10 = vmul.f32 1.442695, %v413_v32  ;;  %v458_v27 = vsub.f32 1.0, %v649_v28  ;;  %v473_v21 = vmul.f32 %v457_v61, %v457_v61 }
 0x191   :  { %v445_v34 = vmul.f32 1.442695, %v414_v20  ;;  %v488_v36 = vmul.f32 0.5, %v472_v50  ;;  %v503_v62 = vmul.f32 %v487_v17, %v1023_v14 }
 0x192   :  { %654 = vpow2.f32 %v443_v10  ;;  %v474_v40 = vmul.f32 %v458_v27, %v458_v27  ;;  %v489_v25 = vmul.f32 0.5, %v473_v21 }
 0x193   :  { %656 = vpow2.f32 %v445_v34  ;;  %v504_v60 = vmul.f32 %v488_v36, %v1026_v18 }
 0x194   :  { %516 = vxpose.xlu0.b32.cont [6/16] (narrow) %v500_v26, 8  ;;  %v490_v41 = vmul.f32 0.5, %v474_v40  ;;  %v505_v9 = vmul.f32 %v489_v25, %v1031_v15 }
 0x196   :  { %v651_v38 = vpop.eup %650  ;;  %v506_v14 = vmul.f32 %v490_v41, %v1035_v58 }
 0x197   :  { %v459_v37 = vsub.f32 1.0, %v651_v38 }
 0x198   :  { %517 = vxpose.xlu0.b32.cont [7/16] (narrow) %v501_v16, 8  ;;  %v653_v35 = vpop.eup %652 }
 0x199   :  { %v460_v0 = vsub.f32 1.0, %v653_v35  ;;  %v475_v29 = vmul.f32 %v459_v37, %v459_v37 }
 0x19b   :  { %v476_v44 = vmul.f32 %v460_v0, %v460_v0  ;;  %v491_v53 = vmul.f32 0.5, %v475_v29 }
 0x19c   :  { %518 = vxpose.xlu0.b32.cont [8/16] (narrow) %v502_v31, 8  ;;  %v655_v7 = vpop.eup %654 }
 0x19d   :  { %v461_v47 = vsub.f32 1.0, %v655_v7  ;;  %v657_v42 = vpop.eup %656  ;;  %v492_v18 = vmul.f32 0.5, %v476_v44  ;;  %v507_v8 = vmul.f32 %v491_v53, %v1041_v45 }
 0x19e   :  { %v462_v51 = vsub.f32 1.0, %v657_v42 }
 0x19f   :  { %v477_v6 = vmul.f32 %v461_v47, %v461_v47  ;;  %v508_v13 = vmul.f32 %v492_v18, %v1046_v55 }
 0x1a0   :  { %519 = vxpose.xlu0.b32.cont [9/16] (narrow) %v503_v62, 8  ;;  %v478_v52 = vmul.f32 %v462_v51, %v462_v51 }
 0x1a1   :  { %v493_v15 = vmul.f32 0.5, %v477_v6 }
 0x1a2   :  { %v494_v33 = vmul.f32 0.5, %v478_v52 }
 0x1a3   :  { %v509_v56 = vmul.f32 %v493_v15, %v1051_v57 }
 0x1a4   :  { %520 = vxpose.xlu0.b32.cont [10/16] (narrow) %v504_v60, 8  ;;  %v510_v58 = vmul.f32 %v494_v33, %v398_v30 }
 0x1a8   :  { %521 = vxpose.xlu0.b32.cont [11/16] (narrow) %v505_v9, 8 }
 0x1ac   :  { %522 = vxpose.xlu0.b32.cont [12/16] (narrow) %v506_v14, 8 }
 0x1b0   :  { %523 = vxpose.xlu0.b32.cont [13/16] (narrow) %v507_v8, 8 }
 0x1b4   :  { %524 = vxpose.xlu0.b32.cont [14/16] (narrow) %v508_v13, 8 }
 0x1b8   :  { %525 = vxpose.xlu0.b32.cont [15/16] (narrow) %v509_v56, 8 }
 0x1bc   :  { %526 = vxpose.xlu0.b32.end [16/16] (narrow) %v510_v58, 8 }
 0x200   :  { %v527_v22 = vpop.trf.xlu0 }
 0x201   :  { %543 = vst [vmem:[#allocation2] sm:$0x1] %v527_v22 }
 0x202   :  { %669 = shalt.err (!%p666_p4)
}
 0x203   :  { %s670_s20 = scalar_lea.hbm %s1078_s2, 16 }
 0x204   :  { %p671_p5 = scmp.ne.s32.totalorder %s1078_s2, %s670_s20  ;;  %p674_p6 = scmp.lt.u32.totalorder %s670_s20, %s1078_s2 }
 0x206   :  { %p676_p7 = pnand %p674_p6, %p671_p5 }
 0x208   :  { %679 = shalt.err (!%p676_p7)
}
 0x209   :  { %553 = dma.vmem_to_hbm [thread:$0]  %s551_s16, 16, %s1078_s2, [#allocation3]  }
 0x20a   :  { %680 = dma.done.wait [#allocation3], 16  }
 0x20b   :  { %681 = vsyncadd [#allocation3], 4294967280 }
 0x20c   :  { %557 = vsyncpa [#allocation3], 1 }

</bundles_post_ra>
